<compile_context>
chip_gen: v7x
topology: tpu7x:2x2x1
jax: 0.10.0
libtpu: 0.0.40
codegen_flags: <defaults>
</compile_context>

<pallas_src>
import jax
import jax.numpy as jnp
from jax.experimental import pallas as pl
from jax.experimental.pallas import tpu as pltpu


def mlp_kernel(x_ref, w1_ref, b1_ref, w2_ref, b2_ref, o_ref):
    # fc1: (TB, D) @ (D, H) on the MXU, bf16 in / f32 accumulate.
    h = jnp.dot(x_ref[...], w1_ref[...], preferred_element_type=jnp.float32)
    # Bias + ReLU in f32 on the VPU ((1, H) bias broadcasts over the TB sublanes).
    h = jnp.maximum(h + b1_ref[...], 0.0)
    # Dropout(p=0.2): identity in eval/inference mode.
    # TODO(synk): training-mode dropout (pltpu.prng_seed/prng_random_bits mask with
    #             1/(1-p) scaling, seeded per grid step) is not emitted here.
    # fc2: H -> 1 as a VPU multiply + cross-lane reduction (XLU slot, off the MXU).
    out = jnp.sum(h * w2_ref[...], axis=1, keepdims=True)
    # b2 is a scalar living in SMEM.
    o_ref[...] = out + b2_ref[0, 0]


def mlp_forward(x, w1, b1, w2, b2, *, block_b=1024):
    """x: (B, D) f32; w1: (D, H); b1: (H,); w2: (H, 1); b2: (1,). Returns (B, 1) f32."""
    B, D = x.shape
    H = w1.shape[1]
    O = w2.shape[1]
    assert O == 1, "kernel's fc2 lane-reduction assumes a single output unit"

    # fc1 matmul operands in bf16 (f32 accumulation happens inside the kernel).
    x_bf = x.astype(jnp.bfloat16)
    w1_bf = w1.astype(jnp.bfloat16)
    b1_row = b1.reshape(1, H).astype(jnp.float32)
    # fc2 weight as a lane-dense (1, H) row for the VPU/XLU reduction.
    w2_row = w2.reshape(1, H).astype(jnp.float32)
    # fc2 bias as a (1, 1) scalar routed through SMEM.
    b2_s = b2.reshape(1, 1).astype(jnp.float32)

    # Batch tile: sublane-aligned (multiple of 8); pad B up to a whole number of tiles
    # so every grid step sees a full tile (padded rows are sliced off after the call).
    tb = max(8, min(block_b, B))
    tb = ((tb + 7) // 8) * 8
    num_blocks = pl.cdiv(B, tb)
    b_pad = num_blocks * tb
    if b_pad != B:
        x_bf = jnp.pad(x_bf, ((0, b_pad - B), (0, 0)))

    out = pl.pallas_call(
        mlp_kernel,
        out_shape=jax.ShapeDtypeStruct((b_pad, O), jnp.float32),
        grid=(num_blocks,),
        in_specs=[
            pl.BlockSpec((tb, D), lambda i: (i, 0)),            # x tile streams
            pl.BlockSpec((D, H), lambda i: (0, 0)),             # w1 resident in VMEM
            pl.BlockSpec((1, H), lambda i: (0, 0)),             # b1 resident
            pl.BlockSpec((1, H), lambda i: (0, 0)),             # w2 row resident
            pl.BlockSpec(memory_space=pltpu.MemorySpace.SMEM),  # b2 scalar in SMEM
        ],
        out_specs=pl.BlockSpec((tb, O), lambda i: (i, 0)),
        compiler_params=pltpu.CompilerParams(
            # Batch tiles are independent -> megacore sharding on v7x; no-op elsewhere.
            dimension_semantics=("parallel",),
            # Headroom for block_b up to ~4096 with double-buffered x/out tiles,
            # while staying under v7x's 64 MiB physical VMEM.
            vmem_limit_bytes=48 * 1024 * 1024,
        ),
    )(x_bf, w1_bf, b1_row, w2_row, b2_s)

    return out[:B] if b_pad != B else out


if __name__ == "__main__":
    # Small shapes consistent with the module: batch=8, input_size=32,
    # hidden_size=128, output_size=1.
    B, D, H, O = 8, 32, 128, 1

    key = jax.random.PRNGKey(0)
    kx, kw1, kb1, kw2, kb2 = jax.random.split(key, 5)

    x = jax.random.normal(kx, (B, D), dtype=jnp.float32)

    # Deterministic synthetic params. PyTorch nn.Linear stores weight as (out, in);
    # build that way and transpose to (in, out) for the kernel's x @ W layout.
    w1_pt = jax.random.normal(kw1, (H, D), dtype=jnp.float32) * 0.05
    b1 = jax.random.normal(kb1, (H,), dtype=jnp.float32) * 0.05
    w2_pt = jax.random.normal(kw2, (O, H), dtype=jnp.float32) * 0.05
    b2 = jax.random.normal(kb2, (O,), dtype=jnp.float32) * 0.05

    w1 = w1_pt.T  # (D, H)
    w2 = w2_pt.T  # (H, O)

    out = mlp_forward(x, w1, b1, w2, b2)
    out = jax.block_until_ready(out)

    # Reference in plain f32 JAX (same math as the PyTorch forward in eval mode,
    # where Dropout(0.2) is the identity).
    ref = jnp.maximum(x @ w1 + b1, 0.0) @ w2 + b2
    assert out.shape == (B, O)
    # bf16 fc1 operands -> widened tolerance vs the pure-f32 reference.
    assert jnp.allclose(out, ref, atol=2e-2, rtol=2e-2)

    print("KERNEL_OK")
</pallas_src>

<mosaic_0001>
module attributes {stable_mosaic.version = 11 : i64} {
  func.func @mlp_kernel(%arg0: i32, %arg1: memref<8x32xbf16, #tpu.memory_space<vmem>>, %arg2: memref<32x128xbf16, #tpu.memory_space<vmem>>, %arg3: memref<1x128xf32, #tpu.memory_space<vmem>>, %arg4: memref<1x128xf32, #tpu.memory_space<vmem>>, %arg5: memref<1x1xf32, #tpu.memory_space<smem>>, %arg6: memref<8x1xf32, #tpu.memory_space<vmem>>) attributes {dimension_semantics = [#tpu.dimension_semantics<parallel>], iteration_bounds = array<i64: 1>, scalar_prefetch = 0 : i64, scratch_operands = 0 : i64, tpu.core_type = #tpu.core_type<tc>, window_params = [{transform_indices = @transform_0, window_bounds = array<i64: 8, 32>}, {pipeline_mode = #tpu.pipeline_mode<synchronous>, transform_indices = @transform_1, window_bounds = array<i64: 32, 128>}, {pipeline_mode = #tpu.pipeline_mode<synchronous>, transform_indices = @transform_2, window_bounds = array<i64: 1, 128>}, {pipeline_mode = #tpu.pipeline_mode<synchronous>, transform_indices = @transform_3, window_bounds = array<i64: 1, 128>}, {transform_indices = @transform_4, window_bounds = array<i64: 1, 1>}, {transform_indices = @transform_5, window_bounds = array<i64: 8, 1>}]} {
    %c0 = arith.constant 0 : index
    %c0_0 = arith.constant 0 : index
    %0 = vector.load %arg1[%c0, %c0_0] : memref<8x32xbf16, #tpu.memory_space<vmem>>, vector<8x32xbf16>
    %c0_1 = arith.constant 0 : index
    %c0_2 = arith.constant 0 : index
    %1 = vector.load %arg2[%c0_1, %c0_2] : memref<32x128xbf16, #tpu.memory_space<vmem>>, vector<32x128xbf16>
    %cst = arith.constant dense<0.000000e+00> : vector<8x128xf32>
    %2 = tpu.matmul %0, %1, %cst {dimension_numbers = #tpu.dot_dimension_numbers<[1], [0], [0], [1], [0, 0, 1, 1], [], []>} : vector<8x32xbf16>, vector<32x128xbf16>, vector<8x128xf32> -> vector<8x128xf32>
    %c0_3 = arith.constant 0 : index
    %c0_4 = arith.constant 0 : index
    %3 = vector.load %arg3[%c0_3, %c0_4] : memref<1x128xf32, #tpu.memory_space<vmem>>, vector<1x128xf32>
    %4 = vector.broadcast %3 : vector<1x128xf32> to vector<8x128xf32>
    %5 = arith.addf %2, %4 : vector<8x128xf32>
    %cst_5 = arith.constant 0.000000e+00 : f32
    %6 = vector.broadcast %cst_5 : f32 to vector<8x128xf32>
    %7 = arith.maximumf %5, %6 : vector<8x128xf32>
    %c0_6 = arith.constant 0 : index
    %c0_7 = arith.constant 0 : index
    %8 = vector.load %arg4[%c0_6, %c0_7] : memref<1x128xf32, #tpu.memory_space<vmem>>, vector<1x128xf32>
    %9 = vector.broadcast %8 : vector<1x128xf32> to vector<8x128xf32>
    %10 = arith.mulf %7, %9 : vector<8x128xf32>
    %cst_8 = arith.constant dense<0.000000e+00> : vector<8xf32>
    %11 = vector.multi_reduction <add>, %10, %cst_8 [1] : vector<8x128xf32> to vector<8xf32>
    %12 = vector.shape_cast %11 : vector<8xf32> to vector<8x1xf32>
    %c0_9 = arith.constant 0 : index
    %c0_10 = arith.constant 0 : index
    %13 = memref.load %arg5[%c0_9, %c0_10] : memref<1x1xf32, #tpu.memory_space<smem>>
    %14 = vector.broadcast %13 : f32 to vector<8x1xf32>
    %15 = arith.addf %12, %14 : vector<8x1xf32>
    %c0_11 = arith.constant 0 : index
    %c0_12 = arith.constant 0 : index
    %16 = vector.load %arg6[%c0_11, %c0_12] : memref<8x1xf32, #tpu.memory_space<vmem>>, vector<8x1xf32>
    tpu.vector_store %arg6[%c0_11, %c0_12], %15 {strides = array<i32>} : memref<8x1xf32, #tpu.memory_space<vmem>>, vector<8x1xf32>,
    return
  }
  func.func @transform_0(%arg0: i32) -> (i32, i32) {
    %c0_i32 = arith.constant 0 : i32
    %c0_i32_0 = arith.constant 0 : i32
    return %arg0, %c0_i32 : i32, i32
  }
  func.func @transform_1(%arg0: i32) -> (i32, i32) {
    %c0_i32 = arith.constant 0 : i32
    %c0_i32_0 = arith.constant 0 : i32
    %c0_i32_1 = arith.constant 0 : i32
    return %c0_i32, %c0_i32_0 : i32, i32
  }
  func.func @transform_2(%arg0: i32) -> (i32, i32) {
    %c0_i32 = arith.constant 0 : i32
    %c0_i32_0 = arith.constant 0 : i32
    %c0_i32_1 = arith.constant 0 : i32
    return %c0_i32, %c0_i32_0 : i32, i32
  }
  func.func @transform_3(%arg0: i32) -> (i32, i32) {
    %c0_i32 = arith.constant 0 : i32
    %c0_i32_0 = arith.constant 0 : i32
    %c0_i32_1 = arith.constant 0 : i32
    return %c0_i32, %c0_i32_0 : i32, i32
  }
  func.func @transform_4(%arg0: i32) -> (i32, i32) {
    %c0_i32 = arith.constant 0 : i32
    %c0_i32_0 = arith.constant 0 : i32
    %c0_i32_1 = arith.constant 0 : i32
    return %c0_i32, %c0_i32_0 : i32, i32
  }
  func.func @transform_5(%arg0: i32) -> (i32, i32) {
    %c0_i32 = arith.constant 0 : i32
    %c0_i32_0 = arith.constant 0 : i32
    return %arg0, %c0_i32 : i32, i32
  }
}

</mosaic_0001>

<bundles_post_ra>
// kernel: tpu_custom_call.1
= control target key start
LH: loop header
LB: loop body
LE: loop exit
PB: predicated region body
PF: predicated region fallthrough
CT: control target
= control target key end

     0   :  { %11 = vsyncpa [#allocation4], 0  ;;  %s289_s0 = inlined_call_operand.hbm [shape: bf16[8,32], index: 0, kind: input, shape index: {}]   ;;  %s290_s1 = inlined_call_operand.hbm [shape: bf16[32,128], index: 1, kind: input, shape index: {}]   ;;  %s291_s2 = inlined_call_operand.vmem [shape: f32[1,128], index: 2, kind: input, shape index: {}]   ;;  %s292_s3 = inlined_call_operand.vmem [shape: f32[1,128], index: 3, kind: input, shape index: {}]   ;;  %s293_s4 = inlined_call_operand.<no memory space> [shape: f32[1,1], index: 4, kind: input, shape index: {}]   ;;  %s294_s5 = inlined_call_operand.vmem [shape: f32[8,1], index: 5, kind: output, shape index: {}]  }
   0x1   :  { %12 = vsyncpa [#allocation6], 0  ;;  %s210_s18 = smov [#allocation3]   ;;  %s211_s20 = smov [#allocation5]  }
   0x2   :  { %s19_s19 = sshll.u32 %s210_s18, 4  ;;  %s28_s21 = sshll.u32 %s211_s20, 4  ;;  %s20_s19 = int_to_ptr.vmem [resolvable:$true] %s19_s19  ;;  %s246_s21 = int_to_ptr.vmem [resolvable:$true] %s28_s21 }
   0x3   :  { %s162_s24 = scalar_lea.hbm %s289_s0, 64 }
   0x4   :  { %p163_p0 = scmp.ne.s32.totalorder %s289_s0, %s162_s24  ;;  %p166_p1 = scmp.lt.u32.totalorder %s162_s24, %s289_s0 }
   0x6   :  { %p168_p2 = pnand %p166_p1, %p163_p0 }
   0x8   :  { %171 = shalt.err (!%p168_p2)
}
   0x9   :  { %s172_s29 = scalar_lea.vmem %s20_s19, 64  ;;  %p177_p4 = scmp.lt.s32.totalorder %s20_s19, %s20_s19 }
   0xa   :  { %p173_p3 = scmp.ne.s32.totalorder %s20_s19, %s172_s29  ;;  %p178_p5 = scmp.lt.s32.totalorder %s172_s29, %s172_s29 }
   0xc   :  { %p179_p6 = por %p178_p5, %p177_p4 }
   0xe   :  { %p180_p7 = pnand %p179_p6, %p173_p3 }
  0x10   :  { %183 = shalt.err (!%p180_p7)
}
  0x11   :  { %22 = dma.hbm_to_vmem [thread:$0]  %s289_s0, 64, %s20_s19, [#allocation4]  }
  0x12   :  { %s184_s9 = scalar_lea.hbm %s290_s1, 256 }
  0x13   :  { %p185_p8 = scmp.ne.s32.totalorder %s290_s1, %s184_s9  ;;  %p188_p9 = scmp.lt.u32.totalorder %s184_s9, %s290_s1 }
  0x15   :  { %p190_p10 = pnand %p188_p9, %p185_p8 }
  0x17   :  { %193 = shalt.err (!%p190_p10)
}
  0x18   :  { %s194_s14 = scalar_lea.vmem %s246_s21, 256  ;;  %p199_p12 = scmp.lt.s32.totalorder %s246_s21, %s246_s21 }
  0x19   :  { %p195_p11 = scmp.ne.s32.totalorder %s246_s21, %s194_s14  ;;  %p200_p13 = scmp.lt.s32.totalorder %s194_s14, %s194_s14 }
  0x1b   :  { %p201_p0 = por %p200_p13, %p199_p12 }
  0x1d   :  { %p202_p1 = pnand %p201_p0, %p195_p11 }
  0x1f   :  { %205 = shalt.err (!%p202_p1)
}
  0x20   :  { %s212_s0 = smov 64   ;;  %s213_s15 = smov 4  }
  0x21   :  { %34 = dma.hbm_to_vmem [thread:$0]  %s290_s1, 256, %s246_s21, [#allocation6], %s212_s0, %s212_s0, %s213_s15  }
  0x22   :  { %206 = dma.done.wait [#allocation4], 64  }
  0x23   :  { %207 = vsyncadd [#allocation4], 4294967232 }
  0x24   :  { %208 = dma.done.wait [#allocation6], 256  }
  0x25   :  { %209 = vsyncadd [#allocation6], 4294967040  ;;  %v214_v0 = vmov 0.0   ;;  %vm215_vm0 = vmmov 0   ;;  %v160_v1 = vld [vmem:[#allocation5] sm:$0xff]   ;;  %v161_v2 = vld [vmem:[#allocation5 + $0x8] sm:$0xff]   ;;  %v128_v13 = vstv %s293_s4 }
  0x26   :  { %146 = vmatprep.subr.bf16.mxu0 %v214_v0  ;;  %150 = vmatprep.mubr.msk.bf16.mxu0 %vm215_vm0, %v214_v0  ;;  %v48_v3 = vld [vmem:[#allocation3] sm:$0xf]  ;;  %vm72_vm1 = vcmask 261120   ;;  %vm130_vm2 = vcmask 7168  }
  0x27   :  { %147 = vmatpush3.bf16.msra.mxu0 %v160_v1  ;;  %v138_v4 = vld [vmem:[%s291_s2] ss:$0 sm:$0xff] }
  0x28   :  { %148 = vmatprep.subr.bf16.mxu0 %v214_v0  ;;  %v142_v9 = vld [vmem:[%s292_s3] ss:$0 sm:$0xff] }
  0x2b   :  { %149 = vmatpush3.bf16.msra.mxu0 %v161_v2 }
  0x2e   :  { %151 = vmatmul.mubr.msk.bf16.vlgmr.msra.gmra.mrb[0].mxu0 %vm72_vm1, %v48_v3 }
 0x101   :  { %v110_v5 = vpop.f32.mrb[0].mxu0 }
 0x102   :  { %v111_v6 = vadd.f32 %v138_v4, %v110_v5  ;;  %v152_v7 = vpop.f32.mrb[1].mxu0 }
 0x103   :  { %v113_v8 = vpop.f32.mrb[2].mxu0 }
 0x104   :  { %v116_v10 = vmax.f32 %v111_v6, 0.0  ;;  %v153_v11 = vpop.f32.mrb[3].mxu0 }
 0x106   :  { %v124_v12 = vmul.f32 %v142_v9, %v116_v10 }
 0x108   :  { %125 = vadd.xlane.f32.xlu0 %v124_v12 }
 0x195   :  { %v126_v14 = vpop.xlane.xlu0 %125 }
 0x196   :  { %v129_v15 = vadd.f32 %v128_v13, %v126_v14 }
 0x198   :  { %131 = vst.msk [vmem:[%s294_s5] sm:$0xff] %vm130_vm2, %v129_v15 }
 0x199   :  { %136 = vsyncpa [#allocation4], 1 }
 0x19a   :  { %137 = vsyncpa [#allocation6], 1 }

</bundles_post_ra>
